<compile_context>
chip_gen: v5e
topology: v5e:2x2
jax: 0.10.0
libtpu: 0.0.40
codegen_flags: <defaults>
</compile_context>

<pallas_src>
import functools
import inspect

import jax
import jax.numpy as jnp
from jax import lax
from jax.experimental import pallas as pl
from jax.experimental.pallas import tpu as pltpu


# ----------------------------- hardware-aware budgets ------------------------


def _vmem_limit_bytes():
    """Scoped-VMEM limit, generation aware (v7x: 64 MiB physical, else 128)."""
    try:
        phys = pltpu.get_tpu_info().vmem_capacity_bytes
    except Exception:  # conservative default = v5e/v6e physical size
        phys = 128 * 1024 * 1024
    # ~25% headroom on v7x (-> 48 MiB); cap at 64 MiB on v5e/v6e.
    return int(min(phys * 3 // 4, 64 * 1024 * 1024))


_HAS_PIPELINE_MODE = False
try:
    _HAS_PIPELINE_MODE = "pipeline_mode" in inspect.signature(pl.BlockSpec).parameters
except (TypeError, ValueError):
    _HAS_PIPELINE_MODE = False


def _stream_spec(block_shape, index_map):
    """BlockSpec for the big streaming operand; 3-deep prefetch when supported."""
    if _HAS_PIPELINE_MODE:
        return pl.BlockSpec(block_shape, index_map, pipeline_mode=pl.Buffered(3))
    return pl.BlockSpec(block_shape, index_map)


def _tiles(rows, hw, itemsize, vmem_limit):
    """Pick (row_tile, lane_tile) for the streaming passes."""
    tile_budget = max(1 << 20, min(vmem_limit // 8, 4 << 20))   # ~4 MiB tiles
    if hw <= 128 or hw * itemsize * 8 <= tile_budget:
        thw = hw                       # full HW rows: contiguous DMA, no masking
    else:
        thw = min((hw // 128) * 128, 8192)
    if rows <= 8:
        tr = rows                      # full-dim block (rows < 8 allowed)
    else:
        tr = min((rows // 8) * 8,
                 max(8, (tile_budget // (thw * itemsize) // 8) * 8))
        # v7x megacore: keep >= 2 steps on the "parallel" row axis so both
        # TensorCores get work (harmless one extra step on 1-TC chips).
        if pl.cdiv(rows, tr) == 1 and rows >= 16:
            tr = max(8, ((rows // 2) // 8) * 8)
    return tr, thw


# ----------------------------- streaming kernels -----------------------------


def _make_stats_kernel(hw_total, thw, mask_cols):
    """Pass A: accumulate per-row sum / sum-of-squares over the HW (lane) axis."""

    def kernel(x_ref, sum_ref, sq_ref):
        j = pl.program_id(1)  # reduction axis over HW tiles (last, "arbitrary")

        @pl.when(j == 0)
        def _():
            sum_ref[...] = jnp.zeros_like(sum_ref)
            sq_ref[...] = jnp.zeros_like(sq_ref)

        x = x_ref[...].astype(jnp.float32)                    # (tr, thw)
        if mask_cols:
            # Partial tail tile (pl.cdiv grid): zero the out-of-range columns.
            col = j * thw + lax.broadcasted_iota(jnp.int32, x.shape, 1)
            x = jnp.where(col < hw_total, x, 0.0)
        sum_ref[...] += jnp.sum(x, axis=1, keepdims=True)      # (tr, 1)
        sq_ref[...] += jnp.sum(x * x, axis=1, keepdims=True)   # (tr, 1)

    return kernel


def _norm_kernel(x_ref, scale_ref, shift_ref, o_ref):
    """Pass B: fused normalize o = x * scale + shift, scale/shift per row."""
    x = x_ref[...].astype(jnp.float32)                         # (tr, thw)
    o_ref[...] = (x * scale_ref[...] + shift_ref[...]).astype(o_ref.dtype)


# ----------------------------- fused single-pass kernel ----------------------


def _make_fused_kernel(eps):
    """Whole activation resident in VMEM: stats + domain combine + normalize."""

    def kernel(x_ref, w0_ref, w1_ref, m0_ref, m1_ref, unk_ref,
               gamma_ref, beta_ref, o_ref):
        x = x_ref[...].astype(jnp.float32)                     # (N, C, HW)
        s = jnp.sum(x, axis=2, keepdims=True)                  # (N, C, 1)
        q = jnp.sum(x * x, axis=2, keepdims=True)              # (N, C, 1)

        def dom(w_ref, g, b):
            w = w_ref[...]                                     # (N,1,1) = 1/(cnt_d*HW) mask
            mean = jnp.sum(s * w, axis=0, keepdims=True)       # (1, C, 1)
            ex2 = jnp.sum(q * w, axis=0, keepdims=True)        # (1, C, 1)
            var = jnp.maximum(ex2 - mean * mean, 0.0)
            inv = lax.rsqrt(var + eps)
            scale = g * inv                                    # (1, C, 1)
            shift = b - mean * scale
            return scale, shift

        sc0, sh0 = dom(w0_ref, gamma_ref[0:1], beta_ref[0:1])
        sc1, sh1 = dom(w1_ref, gamma_ref[1:2], beta_ref[1:2])

        m0 = m0_ref[...]                                       # (N, 1, 1) one-hot
        m1 = m1_ref[...]
        # Unknown domains get identity (scale=1, shift=0) == untouched samples.
        scale_nc = m0 * sc0 + m1 * sc1 + unk_ref[...]          # (N, C, 1)
        shift_nc = m0 * sh0 + m1 * sh1                         # (N, C, 1)
        o_ref[...] = (x * scale_nc + shift_nc).astype(o_ref.dtype)

    return kernel


# ----------------------------- wrapper ---------------------------------------


def dsbn_forward(x_nchw, domains, gamma, beta, eps=1e-5, *,
                 allow_fused=True, in_place=True):
    """Domain-specific BatchNorm2d forward (training-mode statistics).

    x_nchw : (N, C, H, W) float32/bfloat16
    domains: (N,) int32, 0 = SOURCE, 1 = TARGET (others pass through unchanged)
    gamma  : (2, C) per-domain BN weight
    beta   : (2, C) per-domain BN bias
    """
    N, C, H, W = x_nchw.shape
    HW = H * W
    rows = N * C
    dtype = x_nchw.dtype
    itemsize = jnp.dtype(dtype).itemsize
    vmem_limit = _vmem_limit_bytes()

    gamma_f = gamma.astype(jnp.float32)
    beta_f = beta.astype(jnp.float32)

    onehot = (domains[:, None] ==
              jnp.arange(2, dtype=domains.dtype)[None, :]).astype(jnp.float32)  # (N, 2)
    # NOTE: an empty domain gets cnt clamped to 1 (identity-like, never
    # selected); PyTorch's BatchNorm2d on an empty subset would raise instead.
    cnt = jnp.maximum(jnp.sum(onehot, axis=0) * HW, 1.0)                         # (2,)
    unk = 1.0 - jnp.sum(onehot, axis=1)                                          # (N,)

    alias = {0: 0} if in_place else {}

    # ---------------- fused single-pass path (small/medium activations) ------
    # Halves HBM traffic (read+write instead of read+read+write).  Gate is
    # conservative so the f32 working copies fit the scoped VMEM limit.
    if allow_fused and rows * HW * 4 <= vmem_limit // 8:
        x3 = x_nchw.reshape(N, C, HW)                          # free reshape
        w = onehot / cnt[None, :]                              # (N, 2)
        out3 = pl.pallas_call(
            _make_fused_kernel(eps),
            out_shape=jax.ShapeDtypeStruct((N, C, HW), dtype),
            input_output_aliases=alias,
            compiler_params=pltpu.CompilerParams(vmem_limit_bytes=vmem_limit),
        )(x3,
          w[:, 0].reshape(N, 1, 1), w[:, 1].reshape(N, 1, 1),
          onehot[:, 0].reshape(N, 1, 1), onehot[:, 1].reshape(N, 1, 1),
          unk.reshape(N, 1, 1),
          gamma_f.reshape(2, C, 1), beta_f.reshape(2, C, 1))
        return out3.reshape(N, C, H, W)

    # ---------------- two-pass streaming path ---------------------------------
    x2d = x_nchw.reshape(rows, HW)         # free reshape; streams in its own dtype
    tr, thw = _tiles(rows, HW, itemsize, vmem_limit)
    grid_r = pl.cdiv(rows, tr)
    grid_hw = pl.cdiv(HW, thw)
    mask_cols = (HW % thw) != 0

    cparams_stats = pltpu.CompilerParams(
        dimension_semantics=("parallel", "arbitrary"),
        vmem_limit_bytes=vmem_limit)
    cparams_norm = pltpu.CompilerParams(
        dimension_semantics=("parallel", "parallel"),
        vmem_limit_bytes=vmem_limit)

    # ---- pass A: per-(sample, channel) sum / sum-of-squares over HW ----------
    sums, sqs = pl.pallas_call(
        _make_stats_kernel(HW, thw, mask_cols),
        out_shape=(jax.ShapeDtypeStruct((rows, 1), jnp.float32),
                   jax.ShapeDtypeStruct((rows, 1), jnp.float32)),
        grid=(grid_r, grid_hw),
        in_specs=[_stream_spec((tr, thw), lambda i, j: (i, j))],
        out_specs=(pl.BlockSpec((tr, 1), lambda i, j: (i, 0)),
                   pl.BlockSpec((tr, 1), lambda i, j: (i, 0))),
        compiler_params=cparams_stats,
    )(x2d)

    # ---- tiny per-domain combine in plain JAX ---------------------------------
    # TODO(synk): single-sweep E[x^2]-mean^2 can lose precision when |mean|>>std;
    # a shifted/Welford accumulation would be more robust (f32 is fine here).
    sums = sums.reshape(N, C)
    sqs = sqs.reshape(N, C)
    s_d = onehot.T @ sums                                     # (2, C)
    ss_d = onehot.T @ sqs                                     # (2, C)
    mean = s_d / cnt[:, None]
    var = jnp.maximum(ss_d / cnt[:, None] - mean * mean, 0.0)
    inv = lax.rsqrt(var + eps)
    scale_d = gamma_f * inv                                   # (2, C)
    shift_d = beta_f - mean * scale_d                         # (2, C)

    # Per-sample selection; unknown domains get identity (scale=1, shift=0).
    scale_n = onehot @ scale_d + unk[:, None]                 # (N, C)
    shift_n = onehot @ shift_d                                # (N, C)
    scale_rows = scale_n.reshape(rows, 1)
    shift_rows = shift_n.reshape(rows, 1)

    # ---- pass B: fused single-FMA normalize -----------------------------------
    out2d = pl.pallas_call(
        _norm_kernel,
        out_shape=jax.ShapeDtypeStruct((rows, HW), dtype),
        grid=(grid_r, grid_hw),
        in_specs=[_stream_spec((tr, thw), lambda i, j: (i, j)),
                  # scale/shift block index depends only on i -> not re-DMA'd
                  # across the inner j steps.
                  pl.BlockSpec((tr, 1), lambda i, j: (i, 0)),
                  pl.BlockSpec((tr, 1), lambda i, j: (i, 0))],
        out_specs=pl.BlockSpec((tr, thw), lambda i, j: (i, j)),
        input_output_aliases=alias,
        compiler_params=cparams_norm,
    )(x2d, scale_rows, shift_rows)

    return out2d.reshape(N, C, H, W)

    # TODO(synk): running_mean/running_var (eval-mode path) and
    # num_batches_tracked updates are stateful nn.BatchNorm2d buffer
    # bookkeeping and are not part of this forward kernel.


# ----------------------------- reference ------------------------------------


def _reference_dsbn(x_nchw, domains, gamma, beta, eps=1e-5):
    """Pure-JAX reference mirroring the PyTorch forward (training-mode BN)."""
    out = x_nchw
    for d in range(2):
        sel = (domains == d)
        w = sel.astype(jnp.float32)[:, None, None, None]      # (N,1,1,1)
        cnt = jnp.maximum(jnp.sum(w) * x_nchw.shape[2] * x_nchw.shape[3], 1.0)
        mean = jnp.sum(x_nchw * w, axis=(0, 2, 3)) / cnt
        var = jnp.sum((x_nchw ** 2) * w, axis=(0, 2, 3)) / cnt - mean ** 2
        norm = (x_nchw - mean[None, :, None, None]) * lax.rsqrt(
            var[None, :, None, None] + eps)
        norm = norm * gamma[d][None, :, None, None] + beta[d][None, :, None, None]
        out = jnp.where(w > 0, norm, out)
    return out


if __name__ == "__main__":
    key = jax.random.PRNGKey(0)
    N, C, H, W = 4, 8, 16, 16

    kx, _ = jax.random.split(key)
    x = jax.random.normal(kx, (N, C, H, W), dtype=jnp.float32) * 2.0 + 0.5

    # Per-sample domain assignment (what domain_mapping[device] provides).
    domains = jnp.array([0, 1, 0, 1], dtype=jnp.int32)

    # Deterministic per-domain BN parameters (BatchNorm2d init is weight=1,
    # bias=0; perturb slightly so the two domains are distinguishable).
    gamma = jnp.stack([
        1.0 + 0.01 * jnp.arange(C, dtype=jnp.float32),   # SOURCE weight
        1.0 - 0.01 * jnp.arange(C, dtype=jnp.float32),   # TARGET weight
    ])
    beta = jnp.stack([
        0.05 * jnp.arange(C, dtype=jnp.float32),          # SOURCE bias
        -0.05 * jnp.arange(C, dtype=jnp.float32),         # TARGET bias
    ])

    ref = _reference_dsbn(x, domains, gamma, beta)

    # Small shape -> exercises the fused single-pass path.
    fwd_fused = jax.jit(dsbn_forward)
    # Force the two-pass streaming path so both code paths are validated.
    fwd_stream = jax.jit(functools.partial(dsbn_forward, allow_fused=False))

    out_f = jax.block_until_ready(fwd_fused(x, domains, gamma, beta))
    out_s = jax.block_until_ready(fwd_stream(x, domains, gamma, beta))

    assert out_f.shape == x.shape and out_f.dtype == x.dtype
    assert out_s.shape == x.shape and out_s.dtype == x.dtype
    assert jnp.allclose(out_f, ref, atol=1e-4, rtol=1e-4), "fused path mismatch"
    assert jnp.allclose(out_s, ref, atol=1e-4, rtol=1e-4), "two-pass path mismatch"

    print("KERNEL_OK")
</pallas_src>

<mosaic_0001>
module attributes {stable_mosaic.version = 11 : i64} {
  func.func @kernel(%arg0: memref<4x8x256xf32, #tpu.memory_space<vmem>>, %arg1: memref<4x1x1xf32, #tpu.memory_space<vmem>>, %arg2: memref<4x1x1xf32, #tpu.memory_space<vmem>>, %arg3: memref<4x1x1xf32, #tpu.memory_space<vmem>>, %arg4: memref<4x1x1xf32, #tpu.memory_space<vmem>>, %arg5: memref<4x1x1xf32, #tpu.memory_space<vmem>>, %arg6: memref<2x8x1xf32, #tpu.memory_space<vmem>>, %arg7: memref<2x8x1xf32, #tpu.memory_space<vmem>>, %arg8: memref<4x8x256xf32, #tpu.memory_space<vmem>>) attributes {dimension_semantics = [], scalar_prefetch = 0 : i64, scratch_operands = 0 : i64, tpu.core_type = #tpu.core_type<tc>} {
    %c0 = arith.constant 0 : index
    %c0_0 = arith.constant 0 : index
    %c0_1 = arith.constant 0 : index
    %0 = vector.load %arg0[%c0, %c0_0, %c0_1] : memref<4x8x256xf32, #tpu.memory_space<vmem>>, vector<4x8x256xf32>
    %cst = arith.constant dense<0.000000e+00> : vector<4x8xf32>
    %1 = vector.multi_reduction <add>, %0, %cst [2] : vector<4x8x256xf32> to vector<4x8xf32>
    %2 = vector.shape_cast %1 : vector<4x8xf32> to vector<4x8x1xf32>
    %3 = arith.mulf %0, %0 : vector<4x8x256xf32>
    %cst_2 = arith.constant dense<0.000000e+00> : vector<4x8xf32>
    %4 = vector.multi_reduction <add>, %3, %cst_2 [2] : vector<4x8x256xf32> to vector<4x8xf32>
    %5 = vector.shape_cast %4 : vector<4x8xf32> to vector<4x8x1xf32>
    %c0_3 = arith.constant 0 : index
    %c0_4 = arith.constant 0 : index
    %c0_5 = arith.constant 0 : index
    %6 = vector.load %arg6[%c0_3, %c0_4, %c0_5] : memref<2x8x1xf32, #tpu.memory_space<vmem>>, vector<1x8x1xf32>
    %c0_6 = arith.constant 0 : index
    %c0_7 = arith.constant 0 : index
    %c0_8 = arith.constant 0 : index
    %7 = vector.load %arg7[%c0_6, %c0_7, %c0_8] : memref<2x8x1xf32, #tpu.memory_space<vmem>>, vector<1x8x1xf32>
    %c0_9 = arith.constant 0 : index
    %c0_10 = arith.constant 0 : index
    %c0_11 = arith.constant 0 : index
    %8 = vector.load %arg1[%c0_9, %c0_10, %c0_11] : memref<4x1x1xf32, #tpu.memory_space<vmem>>, vector<4x1x1xf32>
    %9 = vector.broadcast %8 : vector<4x1x1xf32> to vector<4x8x1xf32>
    %10 = arith.mulf %2, %9 : vector<4x8x1xf32>
    %cst_12 = arith.constant dense<0.000000e+00> : vector<8x1xf32>
    %11 = vector.multi_reduction <add>, %10, %cst_12 [0] : vector<4x8x1xf32> to vector<8x1xf32>
    %12 = vector.shape_cast %11 : vector<8x1xf32> to vector<1x8x1xf32>
    %13 = vector.broadcast %8 : vector<4x1x1xf32> to vector<4x8x1xf32>
    %14 = arith.mulf %5, %13 : vector<4x8x1xf32>
    %cst_13 = arith.constant dense<0.000000e+00> : vector<8x1xf32>
    %15 = vector.multi_reduction <add>, %14, %cst_13 [0] : vector<4x8x1xf32> to vector<8x1xf32>
    %16 = vector.shape_cast %15 : vector<8x1xf32> to vector<1x8x1xf32>
    %17 = arith.mulf %12, %12 : vector<1x8x1xf32>
    %18 = arith.subf %16, %17 : vector<1x8x1xf32>
    %cst_14 = arith.constant 0.000000e+00 : f32
    %19 = vector.broadcast %cst_14 : f32 to vector<1x8x1xf32>
    %20 = arith.maximumf %18, %19 : vector<1x8x1xf32>
    %cst_15 = arith.constant 9.99999974E-6 : f32
    %21 = vector.broadcast %cst_15 : f32 to vector<1x8x1xf32>
    %22 = arith.addf %20, %21 : vector<1x8x1xf32>
    %23 = math.rsqrt %22 : vector<1x8x1xf32>
    %24 = arith.mulf %6, %23 : vector<1x8x1xf32>
    %25 = arith.mulf %12, %24 : vector<1x8x1xf32>
    %26 = arith.subf %7, %25 : vector<1x8x1xf32>
    %c1 = arith.constant 1 : index
    %c0_16 = arith.constant 0 : index
    %c0_17 = arith.constant 0 : index
    %27 = vector.load %arg6[%c1, %c0_16, %c0_17] : memref<2x8x1xf32, #tpu.memory_space<vmem>>, vector<1x8x1xf32>
    %c1_18 = arith.constant 1 : index
    %c0_19 = arith.constant 0 : index
    %c0_20 = arith.constant 0 : index
    %28 = vector.load %arg7[%c1_18, %c0_19, %c0_20] : memref<2x8x1xf32, #tpu.memory_space<vmem>>, vector<1x8x1xf32>
    %c0_21 = arith.constant 0 : index
    %c0_22 = arith.constant 0 : index
    %c0_23 = arith.constant 0 : index
    %29 = vector.load %arg2[%c0_21, %c0_22, %c0_23] : memref<4x1x1xf32, #tpu.memory_space<vmem>>, vector<4x1x1xf32>
    %30 = vector.broadcast %29 : vector<4x1x1xf32> to vector<4x8x1xf32>
    %31 = arith.mulf %2, %30 : vector<4x8x1xf32>
    %cst_24 = arith.constant dense<0.000000e+00> : vector<8x1xf32>
    %32 = vector.multi_reduction <add>, %31, %cst_24 [0] : vector<4x8x1xf32> to vector<8x1xf32>
    %33 = vector.shape_cast %32 : vector<8x1xf32> to vector<1x8x1xf32>
    %34 = vector.broadcast %29 : vector<4x1x1xf32> to vector<4x8x1xf32>
    %35 = arith.mulf %5, %34 : vector<4x8x1xf32>
    %cst_25 = arith.constant dense<0.000000e+00> : vector<8x1xf32>
    %36 = vector.multi_reduction <add>, %35, %cst_25 [0] : vector<4x8x1xf32> to vector<8x1xf32>
    %37 = vector.shape_cast %36 : vector<8x1xf32> to vector<1x8x1xf32>
    %38 = arith.mulf %33, %33 : vector<1x8x1xf32>
    %39 = arith.subf %37, %38 : vector<1x8x1xf32>
    %cst_26 = arith.constant 0.000000e+00 : f32
    %40 = vector.broadcast %cst_26 : f32 to vector<1x8x1xf32>
    %41 = arith.maximumf %39, %40 : vector<1x8x1xf32>
    %cst_27 = arith.constant 9.99999974E-6 : f32
    %42 = vector.broadcast %cst_27 : f32 to vector<1x8x1xf32>
    %43 = arith.addf %41, %42 : vector<1x8x1xf32>
    %44 = math.rsqrt %43 : vector<1x8x1xf32>
    %45 = arith.mulf %27, %44 : vector<1x8x1xf32>
    %46 = arith.mulf %33, %45 : vector<1x8x1xf32>
    %47 = arith.subf %28, %46 : vector<1x8x1xf32>
    %c0_28 = arith.constant 0 : index
    %c0_29 = arith.constant 0 : index
    %c0_30 = arith.constant 0 : index
    %48 = vector.load %arg3[%c0_28, %c0_29, %c0_30] : memref<4x1x1xf32, #tpu.memory_space<vmem>>, vector<4x1x1xf32>
    %c0_31 = arith.constant 0 : index
    %c0_32 = arith.constant 0 : index
    %c0_33 = arith.constant 0 : index
    %49 = vector.load %arg4[%c0_31, %c0_32, %c0_33] : memref<4x1x1xf32, #tpu.memory_space<vmem>>, vector<4x1x1xf32>
    %50 = vector.broadcast %48 : vector<4x1x1xf32> to vector<4x8x1xf32>
    %51 = vector.broadcast %24 : vector<1x8x1xf32> to vector<4x8x1xf32>
    %52 = arith.mulf %50, %51 : vector<4x8x1xf32>
    %53 = vector.broadcast %49 : vector<4x1x1xf32> to vector<4x8x1xf32>
    %54 = vector.broadcast %45 : vector<1x8x1xf32> to vector<4x8x1xf32>
    %55 = arith.mulf %53, %54 : vector<4x8x1xf32>
    %56 = arith.addf %52, %55 : vector<4x8x1xf32>
    %c0_34 = arith.constant 0 : index
    %c0_35 = arith.constant 0 : index
    %c0_36 = arith.constant 0 : index
    %57 = vector.load %arg5[%c0_34, %c0_35, %c0_36] : memref<4x1x1xf32, #tpu.memory_space<vmem>>, vector<4x1x1xf32>
    %58 = vector.broadcast %57 : vector<4x1x1xf32> to vector<4x8x1xf32>
    %59 = arith.addf %56, %58 : vector<4x8x1xf32>
    %60 = vector.broadcast %48 : vector<4x1x1xf32> to vector<4x8x1xf32>
    %61 = vector.broadcast %26 : vector<1x8x1xf32> to vector<4x8x1xf32>
    %62 = arith.mulf %60, %61 : vector<4x8x1xf32>
    %63 = vector.broadcast %49 : vector<4x1x1xf32> to vector<4x8x1xf32>
    %64 = vector.broadcast %47 : vector<1x8x1xf32> to vector<4x8x1xf32>
    %65 = arith.mulf %63, %64 : vector<4x8x1xf32>
    %66 = arith.addf %62, %65 : vector<4x8x1xf32>
    %67 = vector.broadcast %59 : vector<4x8x1xf32> to vector<4x8x256xf32>
    %68 = arith.mulf %0, %67 : vector<4x8x256xf32>
    %69 = vector.broadcast %66 : vector<4x8x1xf32> to vector<4x8x256xf32>
    %70 = arith.addf %68, %69 : vector<4x8x256xf32>
    %c0_37 = arith.constant 0 : index
    %c0_38 = arith.constant 0 : index
    %c0_39 = arith.constant 0 : index
    %71 = vector.load %arg8[%c0_37, %c0_38, %c0_39] : memref<4x8x256xf32, #tpu.memory_space<vmem>>, vector<4x8x256xf32>
    tpu.vector_store %arg8[%c0_37, %c0_38, %c0_39], %70 {strides = array<i32>} : memref<4x8x256xf32, #tpu.memory_space<vmem>>, vector<4x8x256xf32>,
    return
  }
}

</mosaic_0001>

<bundles_post_ra>
// kernel: dsbn_forward.1
= control target key start
LH: loop header
LB: loop body
LE: loop exit
PB: predicated region body
PF: predicated region fallthrough
CT: control target
= control target key end

     0   :  { %vm91_vm0 = vcmask 7168   ;;  %s600_s0 = inlined_call_operand.vmem [shape: f32[4,8,256], index: 0, kind: input, shape index: {}, may-alias: {0,8}]   ;;  %s601_s1 = inlined_call_operand.vmem [shape: f32[4,1,1], index: 1, kind: input, shape index: {}]   ;;  %s602_s2 = inlined_call_operand.vmem [shape: f32[4,1,1], index: 2, kind: input, shape index: {}]   ;;  %s603_s3 = inlined_call_operand.vmem [shape: f32[4,1,1], index: 3, kind: input, shape index: {}]   ;;  %s604_s4 = inlined_call_operand.vmem [shape: f32[4,1,1], index: 4, kind: input, shape index: {}]   ;;  %s605_s5 = inlined_call_operand.vmem [shape: f32[4,1,1], index: 5, kind: input, shape index: {}]   ;;  %s606_s6 = inlined_call_operand.vmem [shape: f32[2,8,1], index: 6, kind: input, shape index: {}]   ;;  %s607_s7 = inlined_call_operand.vmem [shape: f32[2,8,1], index: 7, kind: input, shape index: {}]   ;;  %s608_s8 = inlined_call_operand.vmem [shape: f32[4,8,256], index: 8, kind: output, shape index: {}, may-alias: {0,8}]  }
   0x1   :  { %v409_v0 = vld [vmem:[%s600_s0 + $0x20] sm:$0xff]  ;;  %v414_v1 = vld [vmem:[%s600_s0 + $0x28] sm:$0xff]  ;;  %v431_v5 = vld [vmem:[%s600_s0 + $0x10] sm:$0xff] }
   0x2   :  { %v419_v2 = vld [vmem:[%s600_s0] sm:$0xff]  ;;  %v43_v3 = vadd.f32 %v414_v1, %v409_v0  ;;  %v426_v4 = vld [vmem:[%s600_s0 + $0x8] sm:$0xff]  ;;  %v436_v6 = vld [vmem:[%s600_s0 + $0x18] sm:$0xff]  ;;  %v51_v8 = vmul.f32 %v431_v5, %v431_v5  ;;  %v53_v20 = vmul.f32 %v409_v0, %v409_v0  ;;  %v54_v21 = vmul.f32 %v414_v1, %v414_v1 }
   0x3   :  { %v37_v7 = vadd.f32 %v426_v4, %v419_v2  ;;  %v52_v9 = vmul.f32 %v436_v6, %v436_v6  ;;  %v49_v10 = vmul.f32 %v419_v2, %v419_v2  ;;  %v50_v11 = vmul.f32 %v426_v4, %v426_v4  ;;  %v451_v14 = vld [vmem:[%s600_s0 + $0x30] sm:$0xff]  ;;  %v456_v15 = vld [vmem:[%s600_s0 + $0x38] sm:$0xff]  ;;  %v338_v26 = vld [vmem:[%s601_s1] ss:$0 sm:$0xff] }
   0x4   :  { %44 = vadd.xlane.f32.xlu1 %v43_v3  ;;  %v40_v16 = vadd.f32 %v436_v6, %v431_v5  ;;  %v46_v17 = vadd.f32 %v456_v15, %v451_v14  ;;  %v55_v18 = vmul.f32 %v451_v14, %v451_v14  ;;  %v56_v19 = vmul.f32 %v456_v15, %v456_v15  ;;  %v339_v27 = vld [vmem:[%s602_s2] ss:$0 sm:$0xff]  ;;  %v336_v29 = vld [vmem:[%s601_s1 + $0x2] ss:$0 sm:$0xff]  ;;  %v340_v31 = vld [vmem:[%s601_s1 + $0x1] ss:$0 sm:$0xff] }
   0x5   :  { %38 = vadd.xlane.f32.xlu0 %v37_v7  ;;  %v60_v12 = vadd.f32 %v52_v9, %v51_v8  ;;  %v57_v13 = vadd.f32 %v50_v11, %v49_v10  ;;  %v63_v23 = vadd.f32 %v54_v21, %v53_v20  ;;  %v337_v30 = vld [vmem:[%s602_s2 + $0x2] ss:$0 sm:$0xff]  ;;  %v341_v32 = vld [vmem:[%s602_s2 + $0x1] ss:$0 sm:$0xff]  ;;  %v342_v37 = vld [vmem:[%s601_s1 + $0x3] ss:$0 sm:$0xff] }
   0x6   :  { %v66_v22 = vadd.f32 %v56_v19, %v55_v18  ;;  %v343_v38 = vld [vmem:[%s602_s2 + $0x3] ss:$0 sm:$0xff]  ;;  %v360_v20 = vmov 0  }
   0x7   :  { %61 = vadd.xlane.f32.xlu2 %v60_v12  ;;  %335 = vset.pattern.permute.xlu1 %v360_v20 }
   0x8   :  { %334 = vset.pattern.permute.xlu0 %v360_v20  ;;  %333 = vset.pattern.permute.xlu2 %v360_v20  ;;  %v331_v20 = vld [vmem:[%s607_s7 + $0x8] sm:$0xff] }
   0xc   :  { %58 = vadd.xlane.f32.xlu1 %v57_v13 }
   0xd   :  { %41 = vadd.xlane.f32.xlu0 %v40_v16 }
   0xf   :  { %47 = vadd.xlane.f32.xlu2 %v46_v17 }
  0x14   :  { %67 = vadd.xlane.f32.xlu1 %v66_v22 }
  0x15   :  { %64 = vadd.xlane.f32.xlu0 %v63_v23 }
  0x77   :  { %v45_v24 = vpop.xlane.xlu1 %44 }
  0x78   :  { %v39_v25 = vpop.xlane.xlu0 %38  ;;  %v89_v39 = vmul.f32 %v336_v29, %v45_v24  ;;  %v149_v40 = vmul.f32 %v337_v30, %v45_v24 }
  0x79   :  { %v87_v33 = vmul.f32 %v338_v26, %v39_v25  ;;  %v147_v34 = vmul.f32 %v339_v27, %v39_v25 }
  0x7a   :  { %v62_v28 = vpop.xlane.xlu2 %61  ;;  %v95_v56 = vsel %vm91_vm0, %v89_v39, 0.0  ;;  %v154_v57 = vsel %vm91_vm0, %v149_v40, 0.0 }
  0x7b   :  { %v92_v43 = vsel %vm91_vm0, %v87_v33, 0.0  ;;  %v151_v44 = vsel %vm91_vm0, %v147_v34, 0.0  ;;  %v100_v45 = vmul.f32 %v340_v31, %v62_v28  ;;  %v159_v48 = vmul.f32 %v341_v32, %v62_v28 }
  0x7d   :  { %v104_v58 = vsel %vm91_vm0, %v100_v45, 0.0  ;;  %v163_v62 = vsel %vm91_vm0, %v159_v48, 0.0  ;;  %v330_v48 = vld [vmem:[%s606_s6 + $0x8] sm:$0xff] }
  0x7f   :  { %v59_v35 = vpop.xlane.xlu1 %58 }
  0x80   :  { %v42_v36 = vpop.xlane.xlu0 %41  ;;  %v99_v46 = vmul.f32 %v338_v26, %v59_v35  ;;  %v158_v49 = vmul.f32 %v339_v27, %v59_v35 }
  0x81   :  { %v88_v41 = vmul.f32 %v340_v31, %v42_v36  ;;  %v148_v42 = vmul.f32 %v341_v32, %v42_v36 }
  0x82   :  { %v48_v47 = vpop.xlane.xlu2 %47  ;;  %v103_v59 = vsel %vm91_vm0, %v99_v46, 0.0  ;;  %v162_v63 = vsel %vm91_vm0, %v158_v49, 0.0  ;;  %v69_v46 = vld [vmem:[%s606_s6] sm:$0xff] }
  0x83   :  { %v93_v50 = vsel %vm91_vm0, %v88_v41, 0.0  ;;  %v152_v51 = vsel %vm91_vm0, %v148_v42, 0.0  ;;  %v90_v54 = vmul.f32 %v342_v37, %v48_v47  ;;  %v150_v55 = vmul.f32 %v343_v38, %v48_v47 }
  0x84   :  { %v94_v52 = vadd.f32 %v93_v50, %v92_v43  ;;  %v153_v53 = vadd.f32 %v152_v51, %v151_v44  ;;  %v105_v12 = vadd.f32 %v104_v58, %v103_v59  ;;  %v164_v17 = vadd.f32 %v163_v62, %v162_v63  ;;  %v344_v50 = vld [vmem:[%s603_s3 + $0x2] ss:$0 sm:$0xff] }
  0x85   :  { %v97_v3 = vsel %vm91_vm0, %v90_v54, 0.0  ;;  %v156_v7 = vsel %vm91_vm0, %v150_v55, 0.0  ;;  %v345_v51 = vld [vmem:[%s604_s4 + $0x2] ss:$0 sm:$0xff]  ;;  %v350_v54 = vld [vmem:[%s603_s3] ss:$0 sm:$0xff] }
  0x86   :  { %v96_v60 = vadd.f32 %v95_v56, %v94_v52  ;;  %v155_v61 = vadd.f32 %v154_v57, %v153_v53  ;;  %v347_v53 = vld [vmem:[%s603_s3 + $0x1] ss:$0 sm:$0xff]  ;;  %v351_v57 = vld [vmem:[%s604_s4] ss:$0 sm:$0xff]  ;;  %v346_v62 = vld [vmem:[%s605_s5 + $0x2] ss:$0 sm:$0xff] }
  0x87   :  { %v68_v8 = vpop.xlane.xlu1 %67  ;;  %v348_v56 = vld [vmem:[%s604_s4 + $0x1] ss:$0 sm:$0xff] }
  0x88   :  { %v65_v9 = vpop.xlane.xlu0 %64  ;;  %v102_v10 = vmul.f32 %v342_v37, %v68_v8  ;;  %v161_v11 = vmul.f32 %v343_v38, %v68_v8  ;;  %v506_v18 = vadd.f32 %v97_v3, %v96_v60  ;;  %v508_v19 = vadd.f32 %v156_v7, %v155_v61 }
  0x89   :  { %v101_v13 = vmul.f32 %v336_v29, %v65_v9  ;;  %v160_v16 = vmul.f32 %v337_v30, %v65_v9  ;;  %v349_v9 = vld [vmem:[%s605_s5 + $0x1] ss:$0 sm:$0xff] }
  0x8a   :  { %v108_v23 = vsel %vm91_vm0, %v102_v10, 0.0  ;;  %v167_v24 = vsel %vm91_vm0, %v161_v11, 0.0  ;;  %v110_v27 = vmul.f32 %v506_v18, %v506_v18  ;;  %v169_v28 = vmul.f32 %v508_v19, %v508_v19  ;;  %v352_v11 = vld [vmem:[%s605_s5] ss:$0 sm:$0xff] }
  0x8b   :  { %v106_v21 = vsel %vm91_vm0, %v101_v13, 0.0  ;;  %v165_v22 = vsel %vm91_vm0, %v160_v16, 0.0  ;;  %v353_v13 = vld [vmem:[%s603_s3 + $0x3] ss:$0 sm:$0xff] }
  0x8c   :  { %v107_v25 = vadd.f32 %v106_v21, %v105_v12  ;;  %v166_v26 = vadd.f32 %v165_v22, %v164_v17  ;;  %v70_v12 = vld [vmem:[%s607_s7] sm:$0xff] }
  0x8d   :  { %v354_v16 = vld [vmem:[%s604_s4 + $0x3] ss:$0 sm:$0xff] }
  0x8e   :  { %v109_v29 = vadd.f32 %v108_v23, %v107_v25  ;;  %v168_v30 = vadd.f32 %v167_v24, %v166_v26 }
  0x90   :  { %v111_v31 = vsub.f32 %v109_v29, %v110_v27  ;;  %v170_v32 = vsub.f32 %v168_v30, %v169_v28 }
  0x92   :  { %v112_v33 = vmax.f32 %v111_v31, 0.0  ;;  %v171_v34 = vmax.f32 %v170_v32, 0.0 }
  0x94   :  { %v113_v35 = vadd.f32 1e-05, %v112_v33  ;;  %v172_v36 = vadd.f32 1e-05, %v171_v34 }
  0x96   :  { %356 = vrsqrt.f32 %v113_v35  ;;  %vm120_vm3 = vweird.f32 %v113_v35  ;;  %vm179_vm5 = vweird.f32 %v172_v36 }
  0x97   :  { %358 = vrsqrt.f32 %v172_v36 }
  0x9c   :  { %v357_v37 = vpop.eup %356 }
  0x9d   :  { %v359_v38 = vpop.eup %358  ;;  %v115_v39 = vmul.f32 %v357_v37, %v113_v35  ;;  %vm121_vm1 = vweird.f32 %v357_v37 }
  0x9e   :  { %v174_v40 = vmul.f32 %v359_v38, %v172_v36  ;;  %vm180_vm2 = vweird.f32 %v359_v38  ;;  %vm122_vm4 = vmor %vm120_vm3, %vm121_vm1 }
  0x9f   :  { %v116_v41 = vmul.f32 %v357_v37, %v115_v39  ;;  %vm181_vm6 = vmor %vm179_vm5, %vm180_vm2 }
  0xa0   :  { %v175_v42 = vmul.f32 %v359_v38, %v174_v40 }
  0xa1   :  { %v117_v43 = vmul.f32 0.5, %v116_v41 }
  0xa2   :  { %v176_v44 = vmul.f32 0.5, %v175_v42 }
  0xa3   :  { %v118_v45 = vsub.f32 1.5, %v117_v43 }
  0xa4   :  { %v177_v47 = vsub.f32 1.5, %v176_v44 }
  0xa5   :  { %v119_v49 = vmul.f32 %v357_v37, %v118_v45 }
  0xa6   :  { %v178_v52 = vmul.f32 %v359_v38, %v177_v47 }
  0xa7   :  { %v123_v55 = vsel %vm122_vm4, %v357_v37, %v119_v49 }
  0xa8   :  { %v124_v58 = vmul.f32 %v123_v55, %v69_v46  ;;  %v182_v59 = vsel %vm181_vm6, %v359_v38, %v178_v52 }
  0xa9   :  { %v183_v60 = vmul.f32 %v330_v48, %v182_v59 }
  0xaa   :  { %v208_v61 = vmul.f32 %v344_v50, %v124_v58  ;;  %v207_v63 = vmul.f32 %v347_v53, %v124_v58  ;;  %v206_v3 = vmul.f32 %v350_v54, %v124_v58  ;;  %v125_v17 = vmul.f32 %v124_v58, %v506_v18 }
  0xab   :  { %v224_v7 = vmul.f32 %v345_v51, %v183_v60  ;;  %v223_v8 = vmul.f32 %v348_v56, %v183_v60  ;;  %v222_v10 = vmul.f32 %v351_v57, %v183_v60  ;;  %v184_v21 = vmul.f32 %v183_v60, %v508_v19  ;;  %v355_v19 = vld [vmem:[%s605_s5 + $0x3] ss:$0 sm:$0xff] }
  0xac   :  { %v126_v25 = vsub.f32 %v70_v12, %v125_v17  ;;  %v209_v30 = vmul.f32 %v353_v13, %v124_v58  ;;  %v225_v31 = vmul.f32 %v354_v16, %v183_v60 }
  0xad   :  { %v228_v22 = vadd.f32 %v224_v7, %v208_v61  ;;  %v227_v23 = vadd.f32 %v223_v8, %v207_v63  ;;  %v226_v24 = vadd.f32 %v222_v10, %v206_v3  ;;  %v185_v29 = vsub.f32 %v331_v20, %v184_v21 }
  0xae   :  { %v251_v18 = vmul.f32 %v347_v53, %v126_v25  ;;  %v229_v33 = vadd.f32 %v225_v31, %v209_v30  ;;  %v253_v36 = vmul.f32 %v353_v13, %v126_v25  ;;  %v250_v38 = vmul.f32 %v350_v54, %v126_v25 }
  0xaf   :  { %v248_v26 = vadd.f32 %v346_v62, %v228_v22  ;;  %v247_v27 = vadd.f32 %v349_v9, %v227_v23  ;;  %v246_v28 = vadd.f32 %v352_v11, %v226_v24  ;;  %v255_v32 = vmul.f32 %v348_v56, %v185_v29 }
  0xb0   :  { %v249_v35 = vadd.f32 %v355_v19, %v229_v33  ;;  %v257_v37 = vmul.f32 %v354_v16, %v185_v29  ;;  %v254_v39 = vmul.f32 %v351_v57, %v185_v29  ;;  %v252_v42 = vmul.f32 %v344_v50, %v126_v25 }
  0xb1   :  { %274 = vperm.xlu1 %335, %v248_v26   ;;  %269 = vperm.xlu0 %334, %v247_v27   ;;  %v259_v34 = vadd.f32 %v255_v32, %v251_v18  ;;  %v256_v43 = vmul.f32 %v345_v51, %v185_v29 }
  0xb2   :  { %264 = vperm.xlu2 %333, %v246_v28   ;;  %v261_v40 = vadd.f32 %v257_v37, %v253_v36  ;;  %v258_v41 = vadd.f32 %v254_v39, %v250_v38 }
  0xb3   :  { %v260_v44 = vadd.f32 %v256_v43, %v252_v42 }
  0xb9   :  { %297 = vperm.xlu1 %335, %v259_v34  }
  0xba   :  { %279 = vperm.xlu2 %333, %v249_v35  }
  0xc1   :  { %307 = vperm.xlu1 %335, %v261_v40  }
  0xc2   :  { %292 = vperm.xlu2 %333, %v258_v41  }
  0xca   :  { %302 = vperm.xlu2 %333, %v260_v44  }
 0x10c   :  { %v265_v45 = vpop.permute.xlu2 %264 }
 0x10d   :  { %v282_v47 = vmul.f32 %v265_v45, %v419_v2  ;;  %v283_v48 = vmul.f32 %v265_v45, %v426_v4 }
 0x114   :  { %v280_v46 = vpop.permute.xlu2 %279 }
 0x115   :  { %v289_v61 = vmul.f32 %v280_v46, %v456_v15 }
 0x11c   :  { %v293_v49 = vpop.permute.xlu2 %292 }
 0x11d   :  { %v310_v52 = vadd.f32 %v293_v49, %v282_v47  ;;  %v311_v53 = vadd.f32 %v293_v49, %v283_v48 }
 0x11f   :  { %318 = vst [vmem:[%s608_s8] sm:$0xff] %v310_v52 }
 0x120   :  { %319 = vst [vmem:[%s608_s8 + $0x8] sm:$0xff] %v311_v53 }
 0x123   :  { %v275_v50 = vpop.permute.xlu1 %274  ;;  %v270_v4 = vpop.permute.xlu0 %269 }
 0x124   :  { %v286_v51 = vmul.f32 %v275_v50, %v409_v0  ;;  %v287_v54 = vmul.f32 %v275_v50, %v414_v1  ;;  %v303_v55 = vpop.permute.xlu2 %302  ;;  %v284_v57 = vmul.f32 %v270_v4, %v431_v5  ;;  %v285_v58 = vmul.f32 %v270_v4, %v436_v6 }
 0x125   :  { %v288_v1 = vmul.f32 %v280_v46, %v451_v14 }
 0x126   :  { %v314_v2 = vadd.f32 %v303_v55, %v286_v51  ;;  %v315_v56 = vadd.f32 %v303_v55, %v287_v54 }
 0x128   :  { %322 = vst [vmem:[%s608_s8 + $0x20] sm:$0xff] %v314_v2 }
 0x129   :  { %323 = vst [vmem:[%s608_s8 + $0x28] sm:$0xff] %v315_v56 }
 0x12b   :  { %v298_v59 = vpop.permute.xlu1 %297 }
 0x12c   :  { %v312_v0 = vadd.f32 %v298_v59, %v284_v57  ;;  %v313_v60 = vadd.f32 %v298_v59, %v285_v58 }
 0x12e   :  { %320 = vst [vmem:[%s608_s8 + $0x10] sm:$0xff] %v312_v0 }
 0x12f   :  { %321 = vst [vmem:[%s608_s8 + $0x18] sm:$0xff] %v313_v60 }
 0x133   :  { %v308_v62 = vpop.permute.xlu1 %307 }
 0x134   :  { %v316_v63 = vadd.f32 %v308_v62, %v288_v1  ;;  %v317_v5 = vadd.f32 %v308_v62, %v289_v61 }
 0x136   :  { %324 = vst [vmem:[%s608_s8 + $0x30] sm:$0xff] %v316_v63 }
 0x137   :  { %325 = vst [vmem:[%s608_s8 + $0x38] sm:$0xff] %v317_v5 }

</bundles_post_ra>
